<compile_context>
chip_gen: v7x
topology: tpu7x:2x2x1
jax: 0.10.0
libtpu: 0.0.40
codegen_flags: <defaults>
</compile_context>

<pallas_src>
import jax
import jax.numpy as jnp
from jax.experimental import pallas as pl
from jax.experimental.pallas import tpu as pltpu


def _make_divisible(v, divisor, min_value=None):
    if min_value is None:
        min_value = divisor
    new_v = max(min_value, int(v + divisor / 2) // divisor * divisor)
    if new_v < 0.9 * v:
        new_v += divisor
    return new_v


def _round_up(v, m):
    return (v + m - 1) // m * m


def _sublane_multiple(dtype):
    # f32 -> 8, bf16 -> 16, int8/fp8 -> 32 (sub-32-bit dtypes pack along sublanes)
    return 8 * (4 // jnp.dtype(dtype).itemsize)


def _padded_tile_bytes(lead, second, last, dtype):
    """VMEM footprint of one (lead, second, last) tile including (sublane, 128)
    layout padding of the trailing two dims."""
    itemsize = jnp.dtype(dtype).itemsize
    return (lead
            * _round_up(second, _sublane_multiple(dtype))
            * _round_up(last, 128)
            * itemsize)


def _vmem_capacity_bytes():
    try:
        return int(pltpu.get_tpu_info().vmem_capacity_bytes)
    except Exception:
        return 64 << 20  # conservative fallback: v7x per-TC physical VMEM


def _pick_batch_tile(b, second, last, dtype, target_tile_bytes, max_tb):
    """Largest divisor of b (<= max_tb) whose padded per-buffer tile fits the
    target (input + output are each double-buffered -> 4x that resident)."""
    best = None
    for tb in range(1, min(b, max_tb) + 1):
        if b % tb == 0 and _padded_tile_bytes(tb, second, last, dtype) <= target_tile_bytes:
            best = tb
    return best


# ------------------------------ kernels -------------------------------------

def _excite(pooled, w1_ref, b1_ref, w2_ref, b2_ref):
    """fc1 -> ReLU -> fc2 -> h_sigmoid on the pooled (tb, c) tensor, f32 accum."""
    h = jnp.dot(pooled, w1_ref[...].astype(jnp.float32),
                preferred_element_type=jnp.float32) + b1_ref[...].astype(jnp.float32)
    h = jnp.maximum(h, 0.0)
    y = jnp.dot(h, w2_ref[...].astype(jnp.float32),
                preferred_element_type=jnp.float32) + b2_ref[...].astype(jnp.float32)
    return jnp.clip(y + 3.0, 0.0, 6.0) * (1.0 / 6.0)  # h_sigmoid


def _se_kernel_cf(x_ref, w1_ref, b1_ref, w2_ref, b2_ref, o_ref):
    # channels-first tile (tb, c, hw); used only when hw % 128 == 0 (lane-dense).
    hw = x_ref.shape[-1]
    pooled = jnp.sum(x_ref[...].astype(jnp.float32), axis=-1) * (1.0 / hw)   # (tb, c)
    y = _excite(pooled, w1_ref, b1_ref, w2_ref, b2_ref)                      # (tb, c)
    # Re-read x_ref for the scale instead of keeping the tile live across the
    # FC path (vld slots are not the binding resource in a DMA-bound kernel).
    o_ref[...] = x_ref[...] * y[:, :, None].astype(o_ref.dtype)


def _se_kernel_cl(x_ref, w1_ref, b1_ref, w2_ref, b2_ref, o_ref):
    # channels-last tile (tb, hw, c); lane dim = c -> unmasked stores for hw<128.
    hw = x_ref.shape[1]
    pooled = jnp.sum(x_ref[...].astype(jnp.float32), axis=1) * (1.0 / hw)    # (tb, c)
    y = _excite(pooled, w1_ref, b1_ref, w2_ref, b2_ref)                      # (tb, c)
    o_ref[...] = x_ref[...] * y[:, None, :].astype(o_ref.dtype)


# ------------------------------ wrapper --------------------------------------

def se_layer(x, w1, b1, w2, b2, *, batch_tile=None):
    """x: (b, c, h, w).  w1: (c, hidden), b1: (1, hidden), w2: (hidden, c),
    b2: (1, c).  Returns (b, c, h, w) in x.dtype."""
    b, c, h, w = x.shape
    hw = h * w
    hidden = w1.shape[1]
    dtype = x.dtype

    # Layout: output lane (last) dim should be 128-dense. Keep channels-first
    # only when hw is already a multiple of 128; otherwise present the block
    # channels-last (the wrapper transpose is layout plumbing done by XLA).
    channels_last = (hw % 128 != 0)
    if channels_last:
        x3 = jnp.transpose(x.reshape(b, c, hw), (0, 2, 1))   # (b, hw, c)
        second, last = hw, c
        kernel = _se_kernel_cl
    else:
        x3 = x.reshape(b, c, hw)                             # (b, c, hw)
        second, last = c, hw
        kernel = _se_kernel_cf

    # Per-generation VMEM budgeting.
    vmem_cap = _vmem_capacity_bytes()
    if vmem_cap >= (100 << 20):        # v5e / v6e: 128 MiB physical VMEM
        target_tile_bytes = 10 << 20   # ~40 MiB resident with 2x in + 2x out bufs
        vmem_limit = 64 << 20
        max_tb = b
    else:                              # v7x: 64 MiB per TC, 2 TCs per chip
        target_tile_bytes = 5 << 20    # ~20 MiB resident
        vmem_limit = 48 << 20
        max_tb = max(1, b // 2)        # keep >= 2 grid steps to feed both TCs

    weight_bytes = (_padded_tile_bytes(1, c, hidden, w1.dtype)
                    + _padded_tile_bytes(1, 1, hidden, b1.dtype)
                    + _padded_tile_bytes(1, hidden, c, w2.dtype)
                    + _padded_tile_bytes(1, 1, c, b2.dtype))

    if batch_tile is None:
        tb = _pick_batch_tile(b, second, last, dtype, target_tile_bytes, max_tb)
        if tb is None:
            tb = 1  # one sample per step; hard-checked against capacity below
    else:
        tb = batch_tile
    assert b % tb == 0, "batch_tile must divide batch"

    needed = 4 * _padded_tile_bytes(tb, second, last, dtype) + weight_bytes
    if needed > vmem_limit:
        vmem_limit = min(_round_up(needed + (2 << 20), 1 << 20), vmem_cap)
    if needed > vmem_cap:
        # TODO(synk): for samples too large for one VMEM tile, split the hw axis
        # into the grid with a pl.when init/finalize pooled accumulator.
        raise ValueError(
            f"SE tile ({needed} bytes at tb={tb}) exceeds VMEM capacity ({vmem_cap} bytes)")

    grid = (b // tb,)

    out = pl.pallas_call(
        kernel,
        out_shape=jax.ShapeDtypeStruct((b, second, last), dtype),
        grid_spec=pltpu.PrefetchScalarGridSpec(
            num_scalar_prefetch=0,
            grid=grid,
            in_specs=[
                # x: tiled over batch, auto double-buffered / pipelined.
                pl.BlockSpec((tb, second, last), lambda i: (i, 0, 0)),
                # weights / biases: grid-invariant -> stay resident in VMEM.
                pl.BlockSpec((c, hidden), lambda i: (0, 0)),
                pl.BlockSpec((1, hidden), lambda i: (0, 0)),
                pl.BlockSpec((hidden, c), lambda i: (0, 0)),
                pl.BlockSpec((1, c), lambda i: (0, 0)),
            ],
            out_specs=pl.BlockSpec((tb, second, last), lambda i: (i, 0, 0)),
        ),
        compiler_params=pltpu.CompilerParams(
            dimension_semantics=("parallel",),   # independent batch tiles
            vmem_limit_bytes=int(vmem_limit),
        ),
    )(x3, w1, b1, w2, b2)

    if channels_last:
        return jnp.transpose(out, (0, 2, 1)).reshape(b, c, h, w)
    return out.reshape(b, c, h, w)


# ------------------------------ reference & test -----------------------------

def _reference(x, w1, b1, w2, b2):
    xf = x.astype(jnp.float32)
    pooled = jnp.mean(xf, axis=(2, 3))                        # (b, c)
    hdn = jnp.maximum(pooled @ w1 + b1, 0.0)                  # (b, hidden)
    y = hdn @ w2 + b2                                         # (b, c)
    y = jnp.clip(y + 3.0, 0.0, 6.0) / 6.0
    return xf * y[:, :, None, None]


def _make_params(key, c, reduction=4):
    hidden = _make_divisible(c // reduction, 8)
    k1, k2, k3, k4 = jax.random.split(key, 4)
    # PyTorch nn.Linear(channel, hidden) stores weight as (hidden, channel);
    # we keep the already-transposed (channel, hidden) layout for the matmul.
    w1 = jax.random.normal(k1, (c, hidden), dtype=jnp.float32) * 0.1
    b1 = jax.random.normal(k2, (1, hidden), dtype=jnp.float32) * 0.1
    w2 = jax.random.normal(k3, (hidden, c), dtype=jnp.float32) * 0.1
    b2 = jax.random.normal(k4, (1, c), dtype=jnp.float32) * 0.1
    return w1, b1, w2, b2


if __name__ == "__main__":
    key = jax.random.PRNGKey(0)
    k0, k1, kp0, kp1 = jax.random.split(key, 4)

    # --- test 1: small NCHW, hw = 256 (multiple of 128) -> channels-first path,
    #             batch_tile=1 forces a 2-step pipelined grid.
    B, C, H, W = 2, 4, 16, 16
    x = jax.random.normal(k0, (B, C, H, W), dtype=jnp.float32)
    w1, b1, w2, b2 = _make_params(kp0, C)
    out = jax.block_until_ready(se_layer(x, w1, b1, w2, b2, batch_tile=1))
    ref = _reference(x, w1, b1, w2, b2)
    assert out.shape == (B, C, H, W)
    assert jnp.allclose(out, ref, atol=1e-4, rtol=1e-4), "mismatch (channels-first f32)"

    # --- test 2: MobileNet-style SE stage, hw = 49 < 128, c = 128 -> channels-last
    #             (lane-dense) path with auto tile picking.
    B2, C2, H2, W2 = 2, 128, 7, 7
    x2 = jax.random.normal(k1, (B2, C2, H2, W2), dtype=jnp.float32)
    w1b, b1b, w2b, b2b = _make_params(kp1, C2)
    out2 = jax.block_until_ready(se_layer(x2, w1b, b1b, w2b, b2b))
    ref2 = _reference(x2, w1b, b1b, w2b, b2b)
    assert out2.shape == (B2, C2, H2, W2)
    assert jnp.allclose(out2, ref2, atol=1e-4, rtol=1e-4), "mismatch (channels-last f32)"

    # --- test 3: bf16 I/O path (HBM-bound kernel -> ~2x wall-clock when the
    #             surrounding model runs bf16); FC matmuls still accumulate f32.
    x3 = x.astype(jnp.bfloat16)
    out3 = jax.block_until_ready(se_layer(x3, w1, b1, w2, b2, batch_tile=1))
    assert out3.dtype == jnp.bfloat16
    assert jnp.allclose(out3.astype(jnp.float32), ref, atol=5e-2, rtol=5e-2), \
        "mismatch (bf16)"

    print("KERNEL_OK")
</pallas_src>

<mosaic_0001>
module attributes {stable_mosaic.version = 11 : i64} {
  func.func @_se_kernel_cf(%arg0: i32, %arg1: memref<1x4x256xf32, #tpu.memory_space<vmem>>, %arg2: memref<4x8xf32, #tpu.memory_space<vmem>>, %arg3: memref<1x8xf32, #tpu.memory_space<vmem>>, %arg4: memref<8x4xf32, #tpu.memory_space<vmem>>, %arg5: memref<1x4xf32, #tpu.memory_space<vmem>>, %arg6: memref<1x4x256xf32, #tpu.memory_space<vmem>>) attributes {dimension_semantics = [#tpu.dimension_semantics<parallel>], iteration_bounds = array<i64: 2>, scalar_prefetch = 0 : i64, scratch_operands = 0 : i64, tpu.core_type = #tpu.core_type<tc>, window_params = [{transform_indices = @transform_0, window_bounds = array<i64: 1, 4, 256>}, {pipeline_mode = #tpu.pipeline_mode<synchronous>, transform_indices = @transform_1, window_bounds = array<i64: 4, 8>}, {pipeline_mode = #tpu.pipeline_mode<synchronous>, transform_indices = @transform_2, window_bounds = array<i64: 1, 8>}, {pipeline_mode = #tpu.pipeline_mode<synchronous>, transform_indices = @transform_3, window_bounds = array<i64: 8, 4>}, {pipeline_mode = #tpu.pipeline_mode<synchronous>, transform_indices = @transform_4, window_bounds = array<i64: 1, 4>}, {transform_indices = @transform_5, window_bounds = array<i64: 1, 4, 256>}]} {
    %c0 = arith.constant 0 : index
    %c0_0 = arith.constant 0 : index
    %c0_1 = arith.constant 0 : index
    %0 = vector.load %arg1[%c0, %c0_0, %c0_1] : memref<1x4x256xf32, #tpu.memory_space<vmem>>, vector<1x4x256xf32>
    %cst = arith.constant dense<0.000000e+00> : vector<1x4xf32>
    %1 = vector.multi_reduction <add>, %0, %cst [2] : vector<1x4x256xf32> to vector<1x4xf32>
    %cst_2 = arith.constant 3.906250e-03 : f32
    %2 = vector.broadcast %cst_2 : f32 to vector<1x4xf32>
    %3 = arith.mulf %1, %2 : vector<1x4xf32>
    %c0_3 = arith.constant 0 : index
    %c0_4 = arith.constant 0 : index
    %4 = vector.load %arg2[%c0_3, %c0_4] : memref<4x8xf32, #tpu.memory_space<vmem>>, vector<4x8xf32>
    %cst_5 = arith.constant dense<0.000000e+00> : vector<1x8xf32>
    %5 = tpu.matmul %3, %4, %cst_5 {dimension_numbers = #tpu.dot_dimension_numbers<[1], [0], [0], [1], [0, 0, 1, 1], [], []>} : vector<1x4xf32>, vector<4x8xf32>, vector<1x8xf32> -> vector<1x8xf32>
    %c0_6 = arith.constant 0 : index
    %c0_7 = arith.constant 0 : index
    %6 = vector.load %arg3[%c0_6, %c0_7] : memref<1x8xf32, #tpu.memory_space<vmem>>, vector<1x8xf32>
    %7 = arith.addf %5, %6 : vector<1x8xf32>
    %cst_8 = arith.constant 0.000000e+00 : f32
    %8 = vector.broadcast %cst_8 : f32 to vector<1x8xf32>
    %9 = arith.maximumf %7, %8 : vector<1x8xf32>
    %c0_9 = arith.constant 0 : index
    %c0_10 = arith.constant 0 : index
    %10 = vector.load %arg4[%c0_9, %c0_10] : memref<8x4xf32, #tpu.memory_space<vmem>>, vector<8x4xf32>
    %cst_11 = arith.constant dense<0.000000e+00> : vector<1x4xf32>
    %11 = tpu.matmul %9, %10, %cst_11 {dimension_numbers = #tpu.dot_dimension_numbers<[1], [0], [0], [1], [0, 0, 1, 1], [], []>} : vector<1x8xf32>, vector<8x4xf32>, vector<1x4xf32> -> vector<1x4xf32>
    %c0_12 = arith.constant 0 : index
    %c0_13 = arith.constant 0 : index
    %12 = vector.load %arg5[%c0_12, %c0_13] : memref<1x4xf32, #tpu.memory_space<vmem>>, vector<1x4xf32>
    %13 = arith.addf %11, %12 : vector<1x4xf32>
    %cst_14 = arith.constant 3.000000e+00 : f32
    %14 = vector.broadcast %cst_14 : f32 to vector<1x4xf32>
    %15 = arith.addf %13, %14 : vector<1x4xf32>
    %cst_15 = arith.constant 0.000000e+00 : f32
    %cst_16 = arith.constant 6.000000e+00 : f32
    %16 = vector.broadcast %cst_15 : f32 to vector<1x4xf32>
    %17 = arith.maximumf %16, %15 : vector<1x4xf32>
    %18 = vector.broadcast %cst_16 : f32 to vector<1x4xf32>
    %19 = arith.minimumf %18, %17 : vector<1x4xf32>
    %cst_17 = arith.constant 0.166666672 : f32
    %20 = vector.broadcast %cst_17 : f32 to vector<1x4xf32>
    %21 = arith.mulf %19, %20 : vector<1x4xf32>
    %c0_18 = arith.constant 0 : index
    %c0_19 = arith.constant 0 : index
    %c0_20 = arith.constant 0 : index
    %22 = vector.load %arg1[%c0_18, %c0_19, %c0_20] : memref<1x4x256xf32, #tpu.memory_space<vmem>>, vector<1x4x256xf32>
    %23 = vector.shape_cast %21 : vector<1x4xf32> to vector<1x4x1xf32>
    %24 = vector.broadcast %23 : vector<1x4x1xf32> to vector<1x4x256xf32>
    %25 = arith.mulf %22, %24 : vector<1x4x256xf32>
    %c0_21 = arith.constant 0 : index
    %c0_22 = arith.constant 0 : index
    %c0_23 = arith.constant 0 : index
    %26 = vector.load %arg6[%c0_21, %c0_22, %c0_23] : memref<1x4x256xf32, #tpu.memory_space<vmem>>, vector<1x4x256xf32>
    tpu.vector_store %arg6[%c0_21, %c0_22, %c0_23], %25 {strides = array<i32>} : memref<1x4x256xf32, #tpu.memory_space<vmem>>, vector<1x4x256xf32>,
    return
  }
  func.func @transform_0(%arg0: i32) -> (i32, i32, i32) {
    %c0_i32 = arith.constant 0 : i32
    %c0_i32_0 = arith.constant 0 : i32
    %c0_i32_1 = arith.constant 0 : i32
    return %arg0, %c0_i32, %c0_i32_0 : i32, i32, i32
  }
  func.func @transform_1(%arg0: i32) -> (i32, i32) {
    %c0_i32 = arith.constant 0 : i32
    %c0_i32_0 = arith.constant 0 : i32
    %c0_i32_1 = arith.constant 0 : i32
    return %c0_i32, %c0_i32_0 : i32, i32
  }
  func.func @transform_2(%arg0: i32) -> (i32, i32) {
    %c0_i32 = arith.constant 0 : i32
    %c0_i32_0 = arith.constant 0 : i32
    %c0_i32_1 = arith.constant 0 : i32
    return %c0_i32, %c0_i32_0 : i32, i32
  }
  func.func @transform_3(%arg0: i32) -> (i32, i32) {
    %c0_i32 = arith.constant 0 : i32
    %c0_i32_0 = arith.constant 0 : i32
    %c0_i32_1 = arith.constant 0 : i32
    return %c0_i32, %c0_i32_0 : i32, i32
  }
  func.func @transform_4(%arg0: i32) -> (i32, i32) {
    %c0_i32 = arith.constant 0 : i32
    %c0_i32_0 = arith.constant 0 : i32
    %c0_i32_1 = arith.constant 0 : i32
    return %c0_i32, %c0_i32_0 : i32, i32
  }
  func.func @transform_5(%arg0: i32) -> (i32, i32, i32) {
    %c0_i32 = arith.constant 0 : i32
    %c0_i32_0 = arith.constant 0 : i32
    %c0_i32_1 = arith.constant 0 : i32
    return %arg0, %c0_i32, %c0_i32_0 : i32, i32, i32
  }
}

</mosaic_0001>

<bundles_post_ra>
// kernel: tpu_custom_call.1
= control target key start
LH: loop header
LB: loop body
LE: loop exit
PB: predicated region body
PF: predicated region fallthrough
CT: control target
= control target key end

     0   :  { %10 = vsyncpa [#allocation3], 0  ;;  %s914_s0 = inlined_call_operand.hbm [shape: f32[2,4,256], index: 0, kind: input, shape index: {}]   ;;  %s915_s1 = inlined_call_operand.vmem [shape: f32[4,8], index: 1, kind: input, shape index: {}]   ;;  %s916_s2 = inlined_call_operand.vmem [shape: f32[1,8], index: 2, kind: input, shape index: {}]   ;;  %s917_s3 = inlined_call_operand.vmem [shape: f32[8,4], index: 3, kind: input, shape index: {}]   ;;  %s918_s4 = inlined_call_operand.vmem [shape: f32[1,4], index: 4, kind: input, shape index: {}]   ;;  %s919_s5 = inlined_call_operand.hbm [shape: f32[2,4,256], index: 5, kind: output, shape index: {}]  }
   0x1   :  { %12 = vsyncpa [#allocation3 + $0x1], 0 }
   0x2   :  { %13 = vsyncpa [#allocation4], 0 }
   0x3   :  { %15 = vsyncpa [#allocation4 + $0x1], 0  ;;  %s737_s18 = smov 0   ;;  %s739_s19 = smov 0  }
   0x4   :  { %s741_s20 = smov 0   ;;  %s743_s21 = smov 0  }
   0x5 LB: > { %s758_s22 = sadd.s32 4294967295, %s700_s21   ;;  %s521_s23 = sadd.s32 4294967294, %s700_s21   ;;  %s700_s21 = sphi %s743_s21, %s934_s21   ;;  %s696_s20 = sphi %s741_s20, %s933_s20   ;;  %s692_s19 = sphi %s739_s19, %s932_s19   ;;  %s688_s18 = sphi %s737_s18, %s931_s18  }
   0x6   : > { %s762_s24 = sadd.s32 1, %s700_s21   ;;  %s28_s25 = sadd.s32 1, %s696_s20 }
   0x7   : > { %s25_s26 = ssub.s32 %s700_s21, %s762_s24  ;;  %p35_p0 = scmp.ne.s32.totalorder %s696_s20, %s692_s19 }
   0x8   : > { %p26_p1 = scmp.eq.s32.totalorder %s25_s26, 0  ;;  %p36_p2 = scmp.eq.s32.totalorder %s700_s21, 0 }
   0x9   : > { %p41_p3 = scmp.ne.s32.totalorder %s692_s19, %s688_s18  ;;  %p42_p4 = scmp.eq.s32.totalorder %s758_s22, 0 }
   0xa   : > { %s774_s27 = scalar_select %p26_p1, %s696_s20, %s28_s25  }
   0xb   : > { %p776_p5 = por %p36_p2, %p35_p0  ;;  %p780_p6 = por %p42_p4, %p41_p3 }
   0xc   : > { %p149_p7 = scmp.eq.s32.totalorder %s758_s22, 1  ;;  %p155_p8 = scmp.eq.s32.totalorder %s521_s23, 1 }
   0xd   : > { %p566_p10 = scmp.lt.s32.totalorder %s700_s21, 2  ;;  %s187_s7 = sand.u32 1, %s696_s20  }
   0xe   : > { %p787_p11 = por %p149_p7, %p35_p0  ;;  %p791_p12 = por %p155_p8, %p41_p3 }
   0xf   : > { %s538_s8 = sshll.u32 %s700_s21, 7  ;;  %s524_s9 = sshll.u32 %s187_s7, 3 }
  0x10   : > { %s923_s30 = scalar_select %p787_p11, 1, 0 }
  0x11   : > { %s924_s6 = scalar_select %p791_p12, 1, 0 }
  0x12   : > { %s800_s12 = scalar_lea.hbm %s914_s0, %s538_s8  ;;  %s191_s13 = scalar_lea.vmem [#allocation2], %s524_s9 }
  0x13   : > { %s199_s14 = sshll.u32 %s191_s13, 4  ;;  %p804_p13 = pnand %p566_p10, %p776_p5  ;;  %s808_s14 = int_to_ptr.vmem [resolvable:$true] %s199_s14 }
  0x14   : > { %s188_s16 = scalar_lea.sflag [#allocation3], %s187_s7  ;;  %s604_s17 = scalar_lea.hbm %s800_s12, 128 }
  0x15   : > { %p605_p2 = scmp.ne.s32.totalorder %s800_s12, %s604_s17  ;;  %p606_p3 = pneg %p804_p13 }
  0x16   : > { %s609_s26 = scalar_lea.hbm %s914_s0, 256  ;;  %p610_p5 = scmp.lt.u32.totalorder %s800_s12, %s914_s0 }
  0x17   : > { %p607_p4 = pnand %p606_p3, %p605_p2  ;;  %p611_p8 = scmp.lt.u32.totalorder %s609_s26, %s604_s17 }
  0x18   : > { %p613_p9 = scmp.lt.u32.totalorder %s604_s17, %s800_s12 }
  0x19   : > { %p608_p7 = pneg %p607_p4  ;;  %p612_p10 = por %p611_p8, %p610_p5 }
  0x1b   : > { %p614_p0 = por %p613_p9, %p612_p10 }
  0x1d   : > { %p615_p1 = pnand %p614_p0, %p608_p7 }
  0x1f   : > { %618 = shalt.err (!%p615_p1)
}
  0x20   : > { %s619_s7 = scalar_lea.vmem %s808_s14, 128  ;;  %s702_s9 = smov [#allocation2]  }
  0x21   : > { %p620_p2 = scmp.ne.s32.totalorder %s808_s14, %s619_s7  ;;  %s624_s10 = sshll.u32 %s702_s9, 4  ;;  %s625_s10 = int_to_ptr.vmem [resolvable:$false] %s624_s10 }
  0x22   : > { %s626_s11 = scalar_lea.vmem %s625_s10, 256  ;;  %p627_p11 = scmp.lt.s32.totalorder %s808_s14, %s625_s10 }
  0x23   : > { %p622_p4 = pnand %p620_p2, %p606_p3  ;;  %p628_p5 = scmp.lt.s32.totalorder %s626_s11, %s619_s7 }
  0x25   : > { %p623_p12 = pneg %p622_p4  ;;  %p629_p8 = por %p628_p5, %p627_p11 }
  0x27   : > { %p630_p9 = pnand %p629_p8, %p623_p12 }
  0x29   : > { %633 = shalt.err (!%p630_p9)
}
  0x2a   : > { %561 = dma.hbm_to_vmem [thread:$0]  (!%p804_p13), %s800_s12, 128, %s808_s14, %s188_s16  }
  0x2b   : > { %p926_p0 = scmp.lt.s32.totalorder %s700_s21, 3  ;;  %p927_p1 = scmp.ge.s32.totalorder %s700_s21, 1 }
  0x2d   : > { %p205_p3 = pnand %p927_p1, %p926_p0 }
  0x2e   : > { %s842_s13 = sand.u32 (!%p205_p3), 1, %s692_s19  }
  0x2f   : > { %208 = sbr.rel (%p205_p3) target bundleno = 780 (0x30c), region = 40  ;;  %s528_s17 = sshll.u32 (!%p205_p3), %s842_s13, 3 }
  0x30   : > { %s211_s23 = scalar_lea.sflag (!%p205_p3), [#allocation3], %s842_s13  ;;  %s214_s15 = scalar_lea.vmem (!%p205_p3), [#allocation2], %s528_s17 }
  0x36   : > { %679 = dma.done.wait (%p780_p6), %s211_s23, 128  }
  0x37   : > { %681 = vsyncadd (%p780_p6), %s211_s23, 4294967168  ;;  %vm245_vm0 = vcmask 1043456   ;;  %v241_v0 = vld [vmem:[%s214_s15] sm:$0xff]  ;;  %v703_v5 = vmov 0.0   ;;  %vm704_vm1 = vmmov 0   ;;  %v255_v7 = vlaneseq  ;;  %s539_s7 = sshll.u32 %s758_s22, 7 }
  0x38   : > { %v243_v1 = vcombine.high %v241_v0, %v241_v0  ;;  %v246_v2 = vsel %vm245_vm0, %v241_v0, 0.0  ;;  %544 = vmatprep.subr.mxu0 %v703_v5  ;;  %v252_v6 = vld [vmem:[%s915_s1] sm:$0xf]  ;;  %549 = vmatprep.subr.mxu1 %v703_v5  ;;  %vm261_vm2 = vcmask 31744   ;;  %vm340_vm3 = vcmask 64512   ;;  %s240_s9 = scalar_lea.vmem [#allocation5], %s528_s17  ;;  %s870_s15 = scalar_lea.hbm %s919_s5, %s539_s7 }
  0x39   : > { %545 = vmatpush3.msk.msra.mxu0 %vm245_vm0, %v252_v6  ;;  %546 = vmatprep.mubr.msk.f32.mxu0 %vm704_vm1, %v703_v5  ;;  %v256_v8 = vand.u32 127, %v255_v7  ;;  %v258_v9 = vshrl.u32 %v255_v7, 7  ;;  %v338_v14 = vld [vmem:[%s917_s3] sm:$0xff]  ;;  %v705_v30 = vmov 839922192   ;;  %s451_s10 = sshll.u32 %s240_s9, 4  ;;  %s872_s10 = int_to_ptr.vmem [resolvable:$true] %s451_s10 }
  0x3a   : > { %v247_v3 = vsel %vm245_vm0, %v243_v1, 0.0  ;;  %551 = vmatprep.mubr.msk.f32.mxu1 %vm704_vm1, %v703_v5  ;;  %550 = vmatpush3.msra.mxu1 %v338_v14  ;;  %v253_v15 = vld [vmem:[%s916_s2] sm:$0x1]  ;;  %v427_v31 = vunpack.c.l.s4 %v705_v30  ;;  %s437_s12 = scalar_lea.sflag [#allocation4], %s842_s13  ;;  %s634_s14 = scalar_lea.vmem %s872_s10, 128 }
  0x3b   : > { %v248_v4 = vadd.f32 %v247_v3, %v246_v2  ;;  %v259_v10 = vsub.s32 %v256_v8, %v258_v9  ;;  %v339_v20 = vld [vmem:[%s918_s4] sm:$0x1]  ;;  %v420_v27 = vsub.s32 0, %v258_v9  ;;  %p635_p6 = scmp.ne.s32.totalorder %s872_s10, %s634_s14  ;;  %p928_p11 = scmp.ne.s32.totalorder %s923_s30, 0 }
  0x3c   : > { %v428_v32 = vunpack.c.0.s8 %v427_v31  ;;  %s706_s22 = smov [#allocation5]  }
  0x3d   : > { %249 = vadd.xlane.f32.xlu0 %v248_v4  ;;  %p636_p12 = pnand %p635_p6, %p928_p11  ;;  %s638_s17 = sshll.u32 %s706_s22, 4  ;;  %s639_s17 = int_to_ptr.vmem [resolvable:$false] %s638_s17 }
  0x3e   : > { %v431_v33 = vsub.s32 %v428_v32, %v258_v9  ;;  %s640_s29 = scalar_lea.vmem %s639_s17, 256  ;;  %p641_p7 = scmp.lt.s32.totalorder %s872_s10, %s639_s17 }
  0x3f   : > { %p637_p13 = pneg %p636_p12  ;;  %p642_p10 = scmp.lt.s32.totalorder %s640_s29, %s634_s14 }
  0x41   : > { %p643_p2 = por %p642_p10, %p641_p7 }
  0x43   : > { %p644_p4 = pnand %p643_p2, %p637_p13 }
  0xca   : > { %v250_v11 = vpop.xlane.xlu0 %249 }
  0xcb   : > { %v251_v12 = vmul.f32 0.00390625, %v250_v11 }
  0xcd   : > { %v260_v13 = vrot.slane %v251_v12, %v259_v10 }
  0xcf   : > { %547 = vmatmul.mubr.msk.f32.vlgmr.msra.gmra.mrb[0].mxu0 %vm261_vm2, %v260_v13 }
 0x1a2   : > { %v333_v16 = vpop.f32.mrb[0].mxu0 }
 0x1a3   : > { %v334_v17 = vadd.f32 %v333_v16, %v253_v15  ;;  %v548_v18 = vpop.f32.mrb[1].mxu0 }
 0x1a5   : > { %v337_v19 = vmax.f32 %v334_v17, 0.0 }
 0x1a7   : > { %552 = vmatmul.mubr.msk.f32.vlgmr.msra.gmra.mrb[0].mxu1 %vm340_vm3, %v337_v19 }
 0x27a   : > { %v410_v21 = vpop.f32.mrb[0].mxu1 }
 0x27b   : > { %v411_v22 = vadd.f32 %v410_v21, %v339_v20  ;;  %v553_v23 = vpop.f32.mrb[1].mxu1 }
 0x27d   : > { %v414_v24 = vadd.f32 3.0, %v411_v22 }
 0x27f   : > { %v415_v25 = vmax.f32 %v414_v24, 0.0 }
 0x281   : > { %v416_v26 = vmin.f32 %v415_v25, 6.0 }
 0x283   : > { %v417_v28 = vmul.f32 0.16666667, %v416_v26 }
 0x285   : > { %v421_v29 = vrot.slane %v417_v28, %v420_v27 }
 0x287   : > { %423 = vbcast.lane.b32.xlu0 %v421_v29, 256 }
 0x2f9   : > { %v424_v34 = vpop.permute.xlu0 %423 }
 0x2fa   : > { %v432_v35 = vrot.slane %v424_v34, %v431_v33 }
 0x2fc   : > { %v434_v36 = vmul.f32 %v432_v35, %v241_v0 }
 0x2fe   : > { %435 = vst [vmem:[%s240_s9] sm:$0xff] %v434_v36 }
 0x2ff   : > { %647 = shalt.err (!%p644_p4)
}
 0x300   : > { %s648_s13 = scalar_lea.hbm %s870_s15, 128  ;;  %s652_s26 = scalar_lea.hbm %s919_s5, 256 }
 0x301   : > { %p649_p5 = scmp.ne.s32.totalorder %s870_s15, %s648_s13  ;;  %p653_p0 = scmp.lt.u32.totalorder %s870_s15, %s919_s5 }
 0x302   : > { %p654_p1 = scmp.lt.u32.totalorder %s652_s26, %s648_s13  ;;  %p656_p6 = scmp.lt.u32.totalorder %s648_s13, %s870_s15 }
 0x303   : > { %p650_p8 = pnand %p649_p5, %p928_p11 }
 0x304   : > { %p655_p3 = por %p654_p1, %p653_p0 }
 0x305   : > { %p651_p9 = pneg %p650_p8 }
 0x306   : > { %p657_p12 = por %p656_p6, %p655_p3 }
 0x308   : > { %p658_p13 = pnand %p657_p12, %p651_p9 }
 0x30a   : > { %661 = shalt.err (!%p658_p13)
}
 0x30b   : > { %556 = dma.vmem_to_hbm [thread:$0]  (%p928_p11), %s872_s10, 128, %s870_s15, %s437_s12  }
 0x30c PF: > { %s463_s7 = sand.u32 1, %s688_s18   ;;  %p929_p7 = scmp.ne.s32.totalorder %s924_s6, 0 }
 0x30d   : > { %p930_p10 = scmp.ge.s32.totalorder %s700_s21, 2  ;;  %s464_s9 = scalar_lea.sflag [#allocation4], %s463_s7 }
 0x30f   : > { %p563_p2 = pnand %p930_p10, %p929_p7 }
 0x311   : > { %683 = dma.done.wait (!%p563_p2), %s464_s9, 128  }
 0x312   : > { %685 = vsyncadd (!%p563_p2), %s464_s9, 4294967168  ;;  %p18_p4 = scmp.ge.s32.totalorder %s762_s24, 4   ;;  %s931_s18 = smov %s692_s19 }
 0x313   : > { %s932_s19 = smov %s696_s20  ;;  %s933_s20 = smov %s774_s27 }
 0x314   : > { %s934_s21 = smov %s762_s24  ;;  %20 = sbr.rel (!%p18_p4) target bundleno = 5 (0x5), region = 85 }
 0x31b   :  { %469 = vsyncpa [#allocation3], 1 }
 0x31c   :  { %471 = vsyncpa [#allocation3 + $0x1], 1 }
 0x31d   :  { %472 = vsyncpa [#allocation4], 1 }
 0x31e   :  { %474 = vsyncpa [#allocation4 + $0x1], 1 }

</bundles_post_ra>
